<compile_context>
chip_gen: v5e
topology: v5e:2x2
jax: 0.10.0
libtpu: 0.0.40
codegen_flags: <defaults>
</compile_context>

<pallas_src>
import functools
import numpy as np
import jax
import jax.numpy as jnp
from jax import lax
from jax.experimental import pallas as pl
from jax.experimental.pallas import tpu as pltpu


def _round_up(x, m):
    return ((x + m - 1) // m) * m


def _hw_config():
    """Per-generation tiling / VMEM budget (v7x has only 64 MiB VMEM per TC)."""
    kind = ""
    try:
        kind = jax.devices()[0].device_kind.lower()
    except Exception:
        pass
    if "v7" in kind:
        cfg = dict(tm_cap=256, tk_cap=4096, vmem=48 * 1024 * 1024)
    elif "v6" in kind:
        cfg = dict(tm_cap=512, tk_cap=8192, vmem=64 * 1024 * 1024)
    elif "v5" in kind:
        cfg = dict(tm_cap=256, tk_cap=2048, vmem=48 * 1024 * 1024)
    else:  # unknown / older generation: conservative defaults
        cfg = dict(tm_cap=256, tk_cap=2048, vmem=32 * 1024 * 1024)
    try:  # cap the scoped limit well under physical VMEM when queryable
        cap = pltpu.get_tpu_info().vmem_capacity_bytes
        cfg["vmem"] = min(cfg["vmem"], int(0.75 * cap))
    except Exception:
        pass
    return cfg


# ----------------------------------------------------------------------------
# Pallas kernel: fused 6-layer MLP head over all (T-1)*B samples
# ----------------------------------------------------------------------------
def actcon_head_kernel(x_ref, w1_ref, con_ref,
                       b1_ref, w2_ref, b2_ref, w3_ref, b3_ref,
                       cw1_ref, cb1_ref, cw2_ref, cb2_ref, cw3_ref, cb3_ref,
                       h_out_ref, c_out_ref, acc_ref):
    # Grid: (M row-tiles ["parallel"], fc1 K-chunks ["arbitrary", last]).
    k = pl.program_id(1)

    def lin_relu(z, w_ref, b_ref):
        # Linear with BN folded in (eval mode), then ReLU.
        w = w_ref[...]
        y = jnp.dot(z.astype(w.dtype), w,
                    preferred_element_type=jnp.float32) + b_ref[...]
        return jnp.maximum(y, 0.0)

    @pl.when(k == 0)
    def _():
        acc_ref[...] = jnp.zeros_like(acc_ref)
        # swin branch on the FIRST K-step (its tile is already resident) so the
        # serial epilogue work is split across first/last steps of each M tile:
        # Con_bn1(Con_fc1) relu; Con_bn2(Con_fc2) relu; [dropout]; Con_bn2(Con_fc3) relu
        c = lin_relu(con_ref[...], cw1_ref, cb1_ref)
        c = lin_relu(c, cw2_ref, cb2_ref)          # dropout == identity (eval)
        c = lin_relu(c, cw3_ref, cb3_ref)          # dropout == identity (eval)
        c_out_ref[...] = c.astype(c_out_ref.dtype)

    # Streamed K-chunk of fc1: bf16 operands, f32 accumulation on the MXU.
    acc_ref[...] += jnp.dot(x_ref[...], w1_ref[...],
                            preferred_element_type=jnp.float32)

    @pl.when(k == pl.num_programs(1) - 1)
    def _():
        # flow branch: bn1(fc1) relu; bn2(fc2) relu; [dropout]; bn2(fc3) relu
        h = jnp.maximum(acc_ref[...] + b1_ref[...], 0.0)
        h = lin_relu(h, w2_ref, b2_ref)            # dropout == identity (eval)
        h = lin_relu(h, w3_ref, b3_ref)            # dropout == identity (eval)
        h_out_ref[...] = h.astype(h_out_ref.dtype)


# ----------------------------------------------------------------------------
# Parameter construction / preparation
# ----------------------------------------------------------------------------
def init_raw_params(key, dx, dc, h1, h2, e, eps=1e-5):
    """Random stand-ins for the Linear/BatchNorm1d parameters (PyTorch-style)."""
    keys = jax.random.split(key, 10)

    def lin(k, din, dout):
        kw, kb = jax.random.split(k)
        lim = 1.0 / np.sqrt(din)
        w = jax.random.uniform(kw, (din, dout), jnp.float32, -lim, lim)
        b = jax.random.uniform(kb, (1, dout), jnp.float32, -lim, lim)
        return w, b

    def bn(k, n):
        k1, k2, k3, k4 = jax.random.split(k, 4)
        gamma = 1.0 + 0.1 * jax.random.normal(k1, (1, n), jnp.float32)
        beta = 0.1 * jax.random.normal(k2, (1, n), jnp.float32)
        mean = 0.1 * jax.random.normal(k3, (1, n), jnp.float32)
        var = 0.5 + jax.nn.softplus(jax.random.normal(k4, (1, n), jnp.float32))
        scale = gamma / jnp.sqrt(var + eps)
        shift = beta - mean * scale
        return scale, shift

    raw = {}
    raw['w1'], raw['b1'] = lin(keys[0], dx, h1); raw['s1'], raw['t1'] = bn(keys[1], h1)
    raw['w2'], raw['b2'] = lin(keys[2], h1, h2); raw['s2'], raw['t2'] = bn(keys[3], h2)
    raw['w3'], raw['b3'] = lin(keys[4], h2, e)
    raw['cw1'], raw['cb1'] = lin(keys[5], dc, h1); raw['cs1'], raw['ct1'] = bn(keys[6], h1)
    raw['cw2'], raw['cb2'] = lin(keys[7], h1, h2); raw['cs2'], raw['ct2'] = bn(keys[8], h2)
    raw['cw3'], raw['cb3'] = lin(keys[9], h2, e)
    return raw


def _fold_bn(w, b, scale, shift):
    # eval-mode BN after Linear: (z@w + b)*scale + shift == z@(w*scale) + (b*scale+shift)
    return (w * scale).astype(jnp.bfloat16), (b * scale + shift).astype(jnp.float32)


def _folded_layers(raw):
    E = raw['w3'].shape[1]
    # TODO(synk): the original forward applies self.bn2 (num_features=fc_hidden2)
    # to the con_embed_dim-sized fc3 output, a shape mismatch in PyTorch; the bn2
    # scale/shift are sliced to the first con_embed_dim features here.
    s3, t3 = raw['s2'][:, :E], raw['t2'][:, :E]
    cs3, ct3 = raw['cs2'][:, :E], raw['ct2'][:, :E]
    flow_layers = [_fold_bn(raw['w1'], raw['b1'], raw['s1'], raw['t1']),
                   _fold_bn(raw['w2'], raw['b2'], raw['s2'], raw['t2']),
                   _fold_bn(raw['w3'], raw['b3'], s3, t3)]
    con_layers = [_fold_bn(raw['cw1'], raw['cb1'], raw['cs1'], raw['ct1']),
                  _fold_bn(raw['cw2'], raw['cb2'], raw['cs2'], raw['ct2']),
                  _fold_bn(raw['cw3'], raw['cb3'], cs3, ct3)]
    return flow_layers, con_layers


def prepare_kernel_params(raw, *, tk):
    """Fold BN, cast weights to bf16, pad fc1's K dim to a multiple of the
    K-chunk `tk` (derived once in the caller) and the embed dim to a lane
    multiple."""
    assert tk % 128 == 0, "fc1 K-chunk must be lane-aligned"
    (W1, B1), (W2, B2), (W3, B3) = _folded_layers(raw)[0]
    (CW1, CB1), (CW2, CB2), (CW3, CB3) = _folded_layers(raw)[1]

    dx, dc, E = W1.shape[0], CW1.shape[0], W3.shape[1]
    dxp = _round_up(dx, tk)
    dcp = _round_up(dc, 128)
    ep = _round_up(E, 128)                  # lane-dense, unmasked output stores

    W1 = jnp.pad(W1, ((0, dxp - dx), (0, 0)))
    CW1 = jnp.pad(CW1, ((0, dcp - dc), (0, 0)))
    W3 = jnp.pad(W3, ((0, 0), (0, ep - E)))
    B3 = jnp.pad(B3, ((0, 0), (0, ep - E)))
    CW3 = jnp.pad(CW3, ((0, 0), (0, ep - E)))
    CB3 = jnp.pad(CB3, ((0, 0), (0, ep - E)))
    return (W1, B1, W2, B2, W3, B3, CW1, CB1, CW2, CB2, CW3, CB3)


# ----------------------------------------------------------------------------
# Forward wrapper
# ----------------------------------------------------------------------------
@functools.partial(jax.jit,
                   static_argnames=("embed_dim", "tk", "tm_cap", "vmem_limit_bytes"))
def actcon_encoder_forward(flow, feats, kparams, *, embed_dim, tk, tm_cap,
                           vmem_limit_bytes):
    """flow:  (B, T-1, 2, Hf, Wf)  RAFT predicted flow per step (NCHW)
       feats: (B, T-1, C, 15, 15)  truncated-swin features per step (NCHW)
       returns (B, T-1, 2*con_embed_dim)"""
    (W1, B1, W2, B2, W3, B3, CW1, CB1, CW2, CB2, CW3, CB3) = kparams
    B, T1 = flow.shape[0], flow.shape[1]
    M = T1 * B
    Dxp, H1 = W1.shape
    Dcp = CW1.shape[0]
    H2 = W2.shape[1]
    Ep = W3.shape[1]
    assert Dxp % tk == 0, "fc1 padding inconsistent with the K-chunk size"

    # Pooling in the wrapper: MaxPool2d(3,3) on the flow and a 3x3/stride-3 avg
    # pool on the swin features (kernel only streams the 9x-smaller result).
    # TODO(synk): AdaptiveAvgPool2d((5,5)) == fixed 3x3/stride-3 average only
    #             when the swin feature map is exactly 15x15.
    def pool(x, op, init):
        return lax.reduce_window(x, jnp.asarray(init, x.dtype), op,
                                 (1, 1, 1, 3, 3), (1, 1, 1, 3, 3), 'VALID')

    xf = pool(flow, lax.max, -jnp.inf)              # (B, T1, C, Ho, Wo)
    cf = pool(feats, lax.add, 0.0) * (1.0 / 9.0)    # (B, T1, C, 5, 5)

    # M tiling: time folded into M; tile as large as the per-gen budget allows
    # (fewer M tiles == fewer re-reads of the streamed fc1 weight).
    tm = min(tm_cap, _round_up(M, 8))
    Mp = _round_up(M, tm)
    m_tiles = Mp // tm

    def flatten_pad(p, d_pad):
        # (B, T1, C, Ho, Wo) -> (M, D) rows in t-major order, PyTorch .view(B,-1)
        # flatten order per sample; cast to bf16 and pad to (Mp, d_pad).
        p = jnp.transpose(p, (1, 0, 2, 3, 4)).reshape(M, -1).astype(jnp.bfloat16)
        return jnp.pad(p, ((0, Mp - M), (0, d_pad - p.shape[1])))

    x_p = flatten_pad(xf, Dxp)          # (Mp, Dxp) bf16
    con_p = flatten_pad(cf, Dcp)        # (Mp, Dcp) bf16

    in_specs = [
        pl.BlockSpec((tm, tk), lambda i, k: (i, k)),     # pooled flow (M-tile, K-chunk)
        pl.BlockSpec((tk, H1), lambda i, k: (k, 0)),     # streamed fc1 weight K-chunk
        pl.BlockSpec((tm, Dcp), lambda i, k: (i, 0)),    # pooled swin features (M-tile)
    ] + [pl.BlockSpec(p.shape, lambda i, k: (0, 0))      # grid-invariant params
         for p in (B1, W2, B2, W3, B3, CW1, CB1, CW2, CB2, CW3, CB3)]

    out_specs = [pl.BlockSpec((tm, Ep), lambda i, k: (i, 0)),
                 pl.BlockSpec((tm, Ep), lambda i, k: (i, 0))]
    out_shape = [jax.ShapeDtypeStruct((Mp, Ep), jnp.bfloat16),
                 jax.ShapeDtypeStruct((Mp, Ep), jnp.bfloat16)]

    flops = 2 * Mp * (Dxp * H1 + 2 * H1 * H2 + 2 * H2 * Ep + Dcp * H1)
    # W1 is re-streamed once per M tile; small params are fetched once; two bf16
    # activation inputs and two bf16 outputs.
    bytes_accessed = (2 * (Mp * Dxp + Mp * Dcp)
                      + 2 * m_tiles * Dxp * H1
                      + 2 * (Dcp * H1 + 2 * H1 * H2 + 2 * H2 * Ep)
                      + 2 * 2 * Mp * Ep)

    h_pad, c_pad = pl.pallas_call(
        actcon_head_kernel,
        out_shape=out_shape,
        grid_spec=pltpu.PrefetchScalarGridSpec(
            num_scalar_prefetch=0,
            grid=(m_tiles, Dxp // tk),
            in_specs=in_specs,
            out_specs=out_specs,
            scratch_shapes=[pltpu.VMEM((tm, H1), jnp.float32)]),
        compiler_params=pltpu.CompilerParams(
            dimension_semantics=("parallel", "arbitrary"),
            vmem_limit_bytes=vmem_limit_bytes),
        cost_estimate=pl.CostEstimate(flops=int(flops), transcendentals=0,
                                      bytes_accessed=int(bytes_accessed)),
    )(x_p, W1, con_p, B1, W2, B2, W3, B3, CW1, CB1, CW2, CB2, CW3, CB3)

    # torch.cat((x, Con_x), dim=1); torch.stack(..., dim=0).transpose_(0,1)
    h = h_pad[:M, :embed_dim].astype(jnp.float32)
    c = c_pad[:M, :embed_dim].astype(jnp.float32)
    out = jnp.concatenate([h, c], axis=-1).reshape(T1, B, 2 * embed_dim)
    return jnp.transpose(out, (1, 0, 2))


# ----------------------------------------------------------------------------
# Pure-JAX reference of the same head (same bf16/f32 math) for correctness
# ----------------------------------------------------------------------------
def reference(flow, feats, raw):
    B, T1 = flow.shape[0], flow.shape[1]
    flow_layers, con_layers = _folded_layers(raw)

    def mlp(z, layers):
        for w, b in layers:
            z = jnp.maximum(jnp.dot(z.astype(jnp.bfloat16), w,
                                    preferred_element_type=jnp.float32) + b, 0.0)
        return z

    outs = []
    for t in range(T1):
        f, g = flow[:, t], feats[:, t]
        C, H, W = f.shape[1:]
        xp = f[:, :, :H - H % 3, :W - W % 3].reshape(B, C, H // 3, 3, W // 3, 3)
        xp = xp.max(axis=(3, 5)).reshape(B, -1)
        Cg, Hg, Wg = g.shape[1:]
        gp = g.reshape(B, Cg, Hg // 3, 3, Wg // 3, 3).mean(axis=(3, 5)).reshape(B, -1)
        h = mlp(xp, flow_layers)
        c = mlp(gp, con_layers)
        outs.append(jnp.concatenate([h, c], axis=1))
    return jnp.stack(outs, axis=1)


if __name__ == "__main__":
    key = jax.random.PRNGKey(0)
    k_flow, k_feat, k_par = jax.random.split(key, 3)

    # Small, forward-consistent shapes (scaled down from the 224x224 / 512 / 300 original)
    B, T = 2, 5                       # x_3d conceptually (B, T, 3, H, W); head uses T-1 steps
    FLOW_C, FLOW_HW = 2, 24           # RAFT flow channels, spatial (MaxPool 3/3 -> 8x8)
    FEAT_C, FEAT_HW = 8, 15           # truncated swin features (AdaptiveAvgPool -> 5x5)
    H1 = H2 = 32                      # fc_hidden1 / fc_hidden2 (512 in the original)
    E = 16                            # con_embed_dim (300 in the original)

    # TODO(synk): timm swin backbone + torchvision RAFT-large are pretrained networks;
    # their outputs are synthesized deterministically here instead of being computed.
    flow = jax.random.normal(k_flow, (B, T - 1, FLOW_C, FLOW_HW, FLOW_HW), jnp.float32)
    feats = jax.random.normal(k_feat, (B, T - 1, FEAT_C, FEAT_HW, FEAT_HW), jnp.float32)

    Dx = FLOW_C * (FLOW_HW // 3) ** 2     # 128    (110720 in the original module)
    Dc = FEAT_C * 5 * 5                   # 200    (1400 in the original module)
    raw = init_raw_params(k_par, Dx, Dc, H1, H2, E)

    # fc1 K-chunk derived ONCE (per-generation cap) and shared by the param
    # padding and the forward wrapper.
    cfg = _hw_config()
    tk = min(cfg["tk_cap"], _round_up(Dx, 128))
    kparams = prepare_kernel_params(raw, tk=tk)

    out = actcon_encoder_forward(flow, feats, kparams, embed_dim=E, tk=tk,
                                 tm_cap=cfg["tm_cap"],
                                 vmem_limit_bytes=cfg["vmem"])
    out = jax.block_until_ready(out)

    ref = reference(flow, feats, raw)
    np.testing.assert_allclose(np.asarray(out), np.asarray(ref), rtol=3e-2, atol=3e-2)
    assert out.shape == (B, T - 1, 2 * E)
    print("KERNEL_OK")
</pallas_src>

<mosaic_0001>
module attributes {stable_mosaic.version = 11 : i64} {
  func.func @actcon_head_kernel(%arg0: i32, %arg1: i32, %arg2: memref<8x128xbf16, #tpu.memory_space<vmem>>, %arg3: memref<128x32xbf16, #tpu.memory_space<vmem>>, %arg4: memref<8x256xbf16, #tpu.memory_space<vmem>>, %arg5: memref<1x32xf32, #tpu.memory_space<vmem>>, %arg6: memref<32x32xbf16, #tpu.memory_space<vmem>>, %arg7: memref<1x32xf32, #tpu.memory_space<vmem>>, %arg8: memref<32x128xbf16, #tpu.memory_space<vmem>>, %arg9: memref<1x128xf32, #tpu.memory_space<vmem>>, %arg10: memref<256x32xbf16, #tpu.memory_space<vmem>>, %arg11: memref<1x32xf32, #tpu.memory_space<vmem>>, %arg12: memref<32x32xbf16, #tpu.memory_space<vmem>>, %arg13: memref<1x32xf32, #tpu.memory_space<vmem>>, %arg14: memref<32x128xbf16, #tpu.memory_space<vmem>>, %arg15: memref<1x128xf32, #tpu.memory_space<vmem>>, %arg16: memref<8x128xbf16, #tpu.memory_space<vmem>>, %arg17: memref<8x128xbf16, #tpu.memory_space<vmem>>, %arg18: memref<8x32xf32, #tpu.memory_space<vmem>>) attributes {dimension_semantics = [#tpu.dimension_semantics<parallel>, #tpu.dimension_semantics<arbitrary>], iteration_bounds = array<i64: 1, 1>, scalar_prefetch = 0 : i64, scratch_operands = 1 : i64, tpu.core_type = #tpu.core_type<tc>, window_params = [{transform_indices = @transform_0, window_bounds = array<i64: 8, 128>}, {transform_indices = @transform_1, window_bounds = array<i64: 128, 32>}, {transform_indices = @transform_2, window_bounds = array<i64: 8, 256>}, {pipeline_mode = #tpu.pipeline_mode<synchronous>, transform_indices = @transform_3, window_bounds = array<i64: 1, 32>}, {pipeline_mode = #tpu.pipeline_mode<synchronous>, transform_indices = @transform_4, window_bounds = array<i64: 32, 32>}, {pipeline_mode = #tpu.pipeline_mode<synchronous>, transform_indices = @transform_5, window_bounds = array<i64: 1, 32>}, {pipeline_mode = #tpu.pipeline_mode<synchronous>, transform_indices = @transform_6, window_bounds = array<i64: 32, 128>}, {pipeline_mode = #tpu.pipeline_mode<synchronous>, transform_indices = @transform_7, window_bounds = array<i64: 1, 128>}, {pipeline_mode = #tpu.pipeline_mode<synchronous>, transform_indices = @transform_8, window_bounds = array<i64: 256, 32>}, {pipeline_mode = #tpu.pipeline_mode<synchronous>, transform_indices = @transform_9, window_bounds = array<i64: 1, 32>}, {pipeline_mode = #tpu.pipeline_mode<synchronous>, transform_indices = @transform_10, window_bounds = array<i64: 32, 32>}, {pipeline_mode = #tpu.pipeline_mode<synchronous>, transform_indices = @transform_11, window_bounds = array<i64: 1, 32>}, {pipeline_mode = #tpu.pipeline_mode<synchronous>, transform_indices = @transform_12, window_bounds = array<i64: 32, 128>}, {pipeline_mode = #tpu.pipeline_mode<synchronous>, transform_indices = @transform_13, window_bounds = array<i64: 1, 128>}, {transform_indices = @transform_14, window_bounds = array<i64: 8, 128>}, {transform_indices = @transform_15, window_bounds = array<i64: 8, 128>}]} {
    %c0_i32 = arith.constant 0 : i32
    %0 = arith.cmpi eq, %arg1, %c0_i32 : i32
    %1 = arith.extui %0 : i1 to i32
    %c0_i32_0 = arith.constant 0 : i32
    %2 = arith.cmpi ne, %1, %c0_i32_0 : i32
    scf.if %2 {
      %cst_10 = arith.constant 0.000000e+00 : f32
      %12 = vector.broadcast %cst_10 : f32 to vector<8x32xf32>
      %c0_11 = arith.constant 0 : index
      %c0_12 = arith.constant 0 : index
      %13 = vector.load %arg18[%c0_11, %c0_12] : memref<8x32xf32, #tpu.memory_space<vmem>>, vector<8x32xf32>
      tpu.vector_store %arg18[%c0_11, %c0_12], %12 {strides = array<i32>} : memref<8x32xf32, #tpu.memory_space<vmem>>, vector<8x32xf32>,
      %c0_13 = arith.constant 0 : index
      %c0_14 = arith.constant 0 : index
      %14 = vector.load %arg4[%c0_13, %c0_14] : memref<8x256xbf16, #tpu.memory_space<vmem>>, vector<8x256xbf16>
      %c0_15 = arith.constant 0 : index
      %c0_16 = arith.constant 0 : index
      %15 = vector.load %arg10[%c0_15, %c0_16] : memref<256x32xbf16, #tpu.memory_space<vmem>>, vector<256x32xbf16>
      %cst_17 = arith.constant dense<0.000000e+00> : vector<8x32xf32>
      %16 = tpu.matmul %14, %15, %cst_17 {dimension_numbers = #tpu.dot_dimension_numbers<[1], [0], [0], [1], [0, 0, 1, 1], [], []>} : vector<8x256xbf16>, vector<256x32xbf16>, vector<8x32xf32> -> vector<8x32xf32>
      %c0_18 = arith.constant 0 : index
      %c0_19 = arith.constant 0 : index
      %17 = vector.load %arg11[%c0_18, %c0_19] : memref<1x32xf32, #tpu.memory_space<vmem>>, vector<1x32xf32>
      %18 = vector.broadcast %17 : vector<1x32xf32> to vector<8x32xf32>
      %19 = arith.addf %16, %18 : vector<8x32xf32>
      %cst_20 = arith.constant 0.000000e+00 : f32
      %20 = vector.broadcast %cst_20 : f32 to vector<8x32xf32>
      %21 = arith.maximumf %19, %20 : vector<8x32xf32>
      %c0_21 = arith.constant 0 : index
      %c0_22 = arith.constant 0 : index
      %22 = vector.load %arg12[%c0_21, %c0_22] : memref<32x32xbf16, #tpu.memory_space<vmem>>, vector<32x32xbf16>
      %23 = arith.truncf %21 : vector<8x32xf32> to vector<8x32xbf16>
      %cst_23 = arith.constant dense<0.000000e+00> : vector<8x32xf32>
      %24 = tpu.matmul %23, %22, %cst_23 {dimension_numbers = #tpu.dot_dimension_numbers<[1], [0], [0], [1], [0, 0, 1, 1], [], []>} : vector<8x32xbf16>, vector<32x32xbf16>, vector<8x32xf32> -> vector<8x32xf32>
      %c0_24 = arith.constant 0 : index
      %c0_25 = arith.constant 0 : index
      %25 = vector.load %arg13[%c0_24, %c0_25] : memref<1x32xf32, #tpu.memory_space<vmem>>, vector<1x32xf32>
      %26 = vector.broadcast %25 : vector<1x32xf32> to vector<8x32xf32>
      %27 = arith.addf %24, %26 : vector<8x32xf32>
      %cst_26 = arith.constant 0.000000e+00 : f32
      %28 = vector.broadcast %cst_26 : f32 to vector<8x32xf32>
      %29 = arith.maximumf %27, %28 : vector<8x32xf32>
      %c0_27 = arith.constant 0 : index
      %c0_28 = arith.constant 0 : index
      %30 = vector.load %arg14[%c0_27, %c0_28] : memref<32x128xbf16, #tpu.memory_space<vmem>>, vector<32x128xbf16>
      %31 = arith.truncf %29 : vector<8x32xf32> to vector<8x32xbf16>
      %cst_29 = arith.constant dense<0.000000e+00> : vector<8x128xf32>
      %32 = tpu.matmul %31, %30, %cst_29 {dimension_numbers = #tpu.dot_dimension_numbers<[1], [0], [0], [1], [0, 0, 1, 1], [], []>} : vector<8x32xbf16>, vector<32x128xbf16>, vector<8x128xf32> -> vector<8x128xf32>
      %c0_30 = arith.constant 0 : index
      %c0_31 = arith.constant 0 : index
      %33 = vector.load %arg15[%c0_30, %c0_31] : memref<1x128xf32, #tpu.memory_space<vmem>>, vector<1x128xf32>
      %34 = vector.broadcast %33 : vector<1x128xf32> to vector<8x128xf32>
      %35 = arith.addf %32, %34 : vector<8x128xf32>
      %cst_32 = arith.constant 0.000000e+00 : f32
      %36 = vector.broadcast %cst_32 : f32 to vector<8x128xf32>
      %37 = arith.maximumf %35, %36 : vector<8x128xf32>
      %38 = arith.truncf %37 : vector<8x128xf32> to vector<8x128xbf16>
      %c0_33 = arith.constant 0 : index
      %c0_34 = arith.constant 0 : index
      %39 = vector.load %arg17[%c0_33, %c0_34] : memref<8x128xbf16, #tpu.memory_space<vmem>>, vector<8x128xbf16>
      tpu.vector_store %arg17[%c0_33, %c0_34], %38 {strides = array<i32>} : memref<8x128xbf16, #tpu.memory_space<vmem>>, vector<8x128xbf16>,
    } else {
    }
    %c0 = arith.constant 0 : index
    %c0_1 = arith.constant 0 : index
    %3 = vector.load %arg18[%c0, %c0_1] : memref<8x32xf32, #tpu.memory_space<vmem>>, vector<8x32xf32>
    %c0_2 = arith.constant 0 : index
    %c0_3 = arith.constant 0 : index
    %4 = vector.load %arg2[%c0_2, %c0_3] : memref<8x128xbf16, #tpu.memory_space<vmem>>, vector<8x128xbf16>
    %c0_4 = arith.constant 0 : index
    %c0_5 = arith.constant 0 : index
    %5 = vector.load %arg3[%c0_4, %c0_5] : memref<128x32xbf16, #tpu.memory_space<vmem>>, vector<128x32xbf16>
    %cst = arith.constant dense<0.000000e+00> : vector<8x32xf32>
    %6 = tpu.matmul %4, %5, %cst {dimension_numbers = #tpu.dot_dimension_numbers<[1], [0], [0], [1], [0, 0, 1, 1], [], []>} : vector<8x128xbf16>, vector<128x32xbf16>, vector<8x32xf32> -> vector<8x32xf32>
    %7 = arith.addf %3, %6 : vector<8x32xf32>
    %c0_6 = arith.constant 0 : index
    %c0_7 = arith.constant 0 : index
    %8 = vector.load %arg18[%c0_6, %c0_7] : memref<8x32xf32, #tpu.memory_space<vmem>>, vector<8x32xf32>
    tpu.vector_store %arg18[%c0_6, %c0_7], %7 {strides = array<i32>} : memref<8x32xf32, #tpu.memory_space<vmem>>, vector<8x32xf32>,
    %c0_i32_8 = arith.constant 0 : i32
    %9 = arith.cmpi eq, %arg1, %c0_i32_8 : i32
    %10 = arith.extui %9 : i1 to i32
    %c0_i32_9 = arith.constant 0 : i32
    %11 = arith.cmpi ne, %10, %c0_i32_9 : i32
    scf.if %11 {
      %c0_10 = arith.constant 0 : index
      %c0_11 = arith.constant 0 : index
      %12 = vector.load %arg18[%c0_10, %c0_11] : memref<8x32xf32, #tpu.memory_space<vmem>>, vector<8x32xf32>
      %c0_12 = arith.constant 0 : index
      %c0_13 = arith.constant 0 : index
      %13 = vector.load %arg5[%c0_12, %c0_13] : memref<1x32xf32, #tpu.memory_space<vmem>>, vector<1x32xf32>
      %14 = vector.broadcast %13 : vector<1x32xf32> to vector<8x32xf32>
      %15 = arith.addf %12, %14 : vector<8x32xf32>
      %cst_14 = arith.constant 0.000000e+00 : f32
      %16 = vector.broadcast %cst_14 : f32 to vector<8x32xf32>
      %17 = arith.maximumf %15, %16 : vector<8x32xf32>
      %c0_15 = arith.constant 0 : index
      %c0_16 = arith.constant 0 : index
      %18 = vector.load %arg6[%c0_15, %c0_16] : memref<32x32xbf16, #tpu.memory_space<vmem>>, vector<32x32xbf16>
      %19 = arith.truncf %17 : vector<8x32xf32> to vector<8x32xbf16>
      %cst_17 = arith.constant dense<0.000000e+00> : vector<8x32xf32>
      %20 = tpu.matmul %19, %18, %cst_17 {dimension_numbers = #tpu.dot_dimension_numbers<[1], [0], [0], [1], [0, 0, 1, 1], [], []>} : vector<8x32xbf16>, vector<32x32xbf16>, vector<8x32xf32> -> vector<8x32xf32>
      %c0_18 = arith.constant 0 : index
      %c0_19 = arith.constant 0 : index
      %21 = vector.load %arg7[%c0_18, %c0_19] : memref<1x32xf32, #tpu.memory_space<vmem>>, vector<1x32xf32>
      %22 = vector.broadcast %21 : vector<1x32xf32> to vector<8x32xf32>
      %23 = arith.addf %20, %22 : vector<8x32xf32>
      %cst_20 = arith.constant 0.000000e+00 : f32
      %24 = vector.broadcast %cst_20 : f32 to vector<8x32xf32>
      %25 = arith.maximumf %23, %24 : vector<8x32xf32>
      %c0_21 = arith.constant 0 : index
      %c0_22 = arith.constant 0 : index
      %26 = vector.load %arg8[%c0_21, %c0_22] : memref<32x128xbf16, #tpu.memory_space<vmem>>, vector<32x128xbf16>
      %27 = arith.truncf %25 : vector<8x32xf32> to vector<8x32xbf16>
      %cst_23 = arith.constant dense<0.000000e+00> : vector<8x128xf32>
      %28 = tpu.matmul %27, %26, %cst_23 {dimension_numbers = #tpu.dot_dimension_numbers<[1], [0], [0], [1], [0, 0, 1, 1], [], []>} : vector<8x32xbf16>, vector<32x128xbf16>, vector<8x128xf32> -> vector<8x128xf32>
      %c0_24 = arith.constant 0 : index
      %c0_25 = arith.constant 0 : index
      %29 = vector.load %arg9[%c0_24, %c0_25] : memref<1x128xf32, #tpu.memory_space<vmem>>, vector<1x128xf32>
      %30 = vector.broadcast %29 : vector<1x128xf32> to vector<8x128xf32>
      %31 = arith.addf %28, %30 : vector<8x128xf32>
      %cst_26 = arith.constant 0.000000e+00 : f32
      %32 = vector.broadcast %cst_26 : f32 to vector<8x128xf32>
      %33 = arith.maximumf %31, %32 : vector<8x128xf32>
      %34 = arith.truncf %33 : vector<8x128xf32> to vector<8x128xbf16>
      %c0_27 = arith.constant 0 : index
      %c0_28 = arith.constant 0 : index
      %35 = vector.load %arg16[%c0_27, %c0_28] : memref<8x128xbf16, #tpu.memory_space<vmem>>, vector<8x128xbf16>
      tpu.vector_store %arg16[%c0_27, %c0_28], %34 {strides = array<i32>} : memref<8x128xbf16, #tpu.memory_space<vmem>>, vector<8x128xbf16>,
    } else {
    }
    return
  }
  func.func @transform_0(%arg0: i32, %arg1: i32) -> (i32, i32) {
    %c0_i32 = arith.constant 0 : i32
    return %arg0, %arg1 : i32, i32
  }
  func.func @transform_1(%arg0: i32, %arg1: i32) -> (i32, i32) {
    %c0_i32 = arith.constant 0 : i32
    %c0_i32_0 = arith.constant 0 : i32
    return %arg1, %c0_i32 : i32, i32
  }
  func.func @transform_2(%arg0: i32, %arg1: i32) -> (i32, i32) {
    %c0_i32 = arith.constant 0 : i32
    %c0_i32_0 = arith.constant 0 : i32
    return %arg0, %c0_i32 : i32, i32
  }
  func.func @transform_3(%arg0: i32, %arg1: i32) -> (i32, i32) {
    %c0_i32 = arith.constant 0 : i32
    %c0_i32_0 = arith.constant 0 : i32
    %c0_i32_1 = arith.constant 0 : i32
    return %c0_i32, %c0_i32_0 : i32, i32
  }
  func.func @transform_4(%arg0: i32, %arg1: i32) -> (i32, i32) {
    %c0_i32 = arith.constant 0 : i32
    %c0_i32_0 = arith.constant 0 : i32
    %c0_i32_1 = arith.constant 0 : i32
    return %c0_i32, %c0_i32_0 : i32, i32
  }
  func.func @transform_5(%arg0: i32, %arg1: i32) -> (i32, i32) {
    %c0_i32 = arith.constant 0 : i32
    %c0_i32_0 = arith.constant 0 : i32
    %c0_i32_1 = arith.constant 0 : i32
    return %c0_i32, %c0_i32_0 : i32, i32
  }
  func.func @transform_6(%arg0: i32, %arg1: i32) -> (i32, i32) {
    %c0_i32 = arith.constant 0 : i32
    %c0_i32_0 = arith.constant 0 : i32
    %c0_i32_1 = arith.constant 0 : i32
    return %c0_i32, %c0_i32_0 : i32, i32
  }
  func.func @transform_7(%arg0: i32, %arg1: i32) -> (i32, i32) {
    %c0_i32 = arith.constant 0 : i32
    %c0_i32_0 = arith.constant 0 : i32
    %c0_i32_1 = arith.constant 0 : i32
    return %c0_i32, %c0_i32_0 : i32, i32
  }
  func.func @transform_8(%arg0: i32, %arg1: i32) -> (i32, i32) {
    %c0_i32 = arith.constant 0 : i32
    %c0_i32_0 = arith.constant 0 : i32
    %c0_i32_1 = arith.constant 0 : i32
    return %c0_i32, %c0_i32_0 : i32, i32
  }
  func.func @transform_9(%arg0: i32, %arg1: i32) -> (i32, i32) {
    %c0_i32 = arith.constant 0 : i32
    %c0_i32_0 = arith.constant 0 : i32
    %c0_i32_1 = arith.constant 0 : i32
    return %c0_i32, %c0_i32_0 : i32, i32
  }
  func.func @transform_10(%arg0: i32, %arg1: i32) -> (i32, i32) {
    %c0_i32 = arith.constant 0 : i32
    %c0_i32_0 = arith.constant 0 : i32
    %c0_i32_1 = arith.constant 0 : i32
    return %c0_i32, %c0_i32_0 : i32, i32
  }
  func.func @transform_11(%arg0: i32, %arg1: i32) -> (i32, i32) {
    %c0_i32 = arith.constant 0 : i32
    %c0_i32_0 = arith.constant 0 : i32
    %c0_i32_1 = arith.constant 0 : i32
    return %c0_i32, %c0_i32_0 : i32, i32
  }
  func.func @transform_12(%arg0: i32, %arg1: i32) -> (i32, i32) {
    %c0_i32 = arith.constant 0 : i32
    %c0_i32_0 = arith.constant 0 : i32
    %c0_i32_1 = arith.constant 0 : i32
    return %c0_i32, %c0_i32_0 : i32, i32
  }
  func.func @transform_13(%arg0: i32, %arg1: i32) -> (i32, i32) {
    %c0_i32 = arith.constant 0 : i32
    %c0_i32_0 = arith.constant 0 : i32
    %c0_i32_1 = arith.constant 0 : i32
    return %c0_i32, %c0_i32_0 : i32, i32
  }
  func.func @transform_14(%arg0: i32, %arg1: i32) -> (i32, i32) {
    %c0_i32 = arith.constant 0 : i32
    %c0_i32_0 = arith.constant 0 : i32
    return %arg0, %c0_i32 : i32, i32
  }
  func.func @transform_15(%arg0: i32, %arg1: i32) -> (i32, i32) {
    %c0_i32 = arith.constant 0 : i32
    %c0_i32_0 = arith.constant 0 : i32
    return %arg0, %c0_i32 : i32, i32
  }
}

</mosaic_0001>

<bundles_post_ra>
// kernel: actcon_encoder_forward.1
= control target key start
LH: loop header
LB: loop body
LE: loop exit
PB: predicated region body
PF: predicated region fallthrough
CT: control target
= control target key end

     0   :  { %vm54_vm0 = vcmask 261120   ;;  %v650_v43 = vmov 0.0   ;;  %s863_s8 = inlined_call_operand.vmem [shape: bf16[256,32], index: 8, kind: input, shape index: {}]   ;;  %s864_s10 = inlined_call_operand.vmem [shape: bf16[32,32], index: 10, kind: input, shape index: {}]   ;;  %s865_s1 = inlined_call_operand.vmem [shape: bf16[128,32], index: 1, kind: input, shape index: {}]   ;;  %s866_s9 = inlined_call_operand.vmem [shape: f32[1,32], index: 9, kind: input, shape index: {}]   ;;  %s867_s2 = inlined_call_operand.vmem [shape: bf16[8,256], index: 2, kind: input, shape index: {}]   ;;  %s868_s11 = inlined_call_operand.vmem [shape: f32[1,32], index: 11, kind: input, shape index: {}]   ;;  %s869_s0 = inlined_call_operand.vmem [shape: bf16[8,128], index: 0, kind: input, shape index: {}]   ;;  %s870_s3 = inlined_call_operand.vmem [shape: f32[1,32], index: 3, kind: input, shape index: {}]   ;;  %s871_s13 = inlined_call_operand.vmem [shape: f32[1,128], index: 13, kind: input, shape index: {}]   ;;  %s872_s12 = inlined_call_operand.vmem [shape: bf16[32,128], index: 12, kind: input, shape index: {}]   ;;  %s873_s4 = inlined_call_operand.vmem [shape: bf16[32,32], index: 4, kind: input, shape index: {}]   ;;  %s874_s5 = inlined_call_operand.vmem [shape: f32[1,32], index: 5, kind: input, shape index: {}]   ;;  %s875_s7 = inlined_call_operand.vmem [shape: f32[1,128], index: 7, kind: input, shape index: {}]   ;;  %s876_s6 = inlined_call_operand.vmem [shape: bf16[32,128], index: 6, kind: input, shape index: {}]   ;;  %s877_s15 = inlined_call_operand.vmem [shape: bf16[8,128], index: 15, kind: output, shape index: {1}]   ;;  %s878_s14 = inlined_call_operand.vmem [shape: bf16[8,128], index: 14, kind: output, shape index: {0}]  }
   0x1   :  { %v618_v0 = vld [vmem:[%s863_s8 + $0x38] sm:$0xff]  ;;  %v617_v2 = vld [vmem:[%s863_s8 + $0x30] sm:$0xff]  ;;  %v628_v4 = vld [vmem:[%s864_s10 + $0x8] sm:$0xff]  ;;  %55 = vst.msk [vmem:[#allocation2] sm:$0xff] %vm54_vm0, %v650_v43 }
   0x2   :  { %v626_v1 = vld [vmem:[%s863_s8 + $0x78] sm:$0xff]  ;;  %196 = vmatpush.bf16.msra.mxu0 %v618_v0  ;;  %v625_v3 = vld [vmem:[%s863_s8 + $0x70] sm:$0xff]  ;;  %v616_v5 = vld [vmem:[%s863_s8 + $0x28] sm:$0xff]  ;;  %253 = vmatpush.bf16.msra.mxu2 %v628_v4 }
   0x3   :  { %209 = vmatpush.bf16.msra.mxu1 %v626_v1  ;;  %v624_v6 = vld [vmem:[%s863_s8 + $0x68] sm:$0xff]  ;;  %v627_v7 = vld [vmem:[%s864_s10] sm:$0xff]  ;;  %v638_v8 = vld [vmem:[%s865_s1 + $0x38] sm:$0xff] }
   0x4   :  { %v615_v9 = vld [vmem:[%s863_s8 + $0x20] sm:$0xff]  ;;  %v637_v11 = vld [vmem:[%s865_s1 + $0x30] sm:$0xff]  ;;  %v614_v12 = vld [vmem:[%s863_s8 + $0x18] sm:$0xff] }
   0x5   :  { %v623_v10 = vld [vmem:[%s863_s8 + $0x60] sm:$0xff]  ;;  %v622_v13 = vld [vmem:[%s863_s8 + $0x58] sm:$0xff]  ;;  %v613_v14 = vld [vmem:[%s863_s8 + $0x10] sm:$0xff] }
   0x6   :  { %197 = vmatpush.bf16.msra.mxu0 %v617_v2  ;;  %254 = vmatpush.bf16.msra.mxu2 %v627_v7  ;;  %v621_v15 = vld [vmem:[%s863_s8 + $0x50] sm:$0xff]  ;;  %v612_v16 = vld [vmem:[%s863_s8 + $0x8] sm:$0xff]  ;;  %v56_v18 = vld [vmem:[%s867_s2] sm:$0xff] }
   0x7   :  { %210 = vmatpush.bf16.msra.mxu1 %v625_v3  ;;  %v620_v17 = vld [vmem:[%s863_s8 + $0x48] sm:$0xff]  ;;  %v94_v19 = vunpack.c.l.b16 %v56_v18  ;;  %v95_v20 = vunpack.c.h.b16 %v56_v18  ;;  %v611_v21 = vld [vmem:[%s863_s8] sm:$0xff]  ;;  %v634_v27 = vld [vmem:[%s865_s1 + $0x18] sm:$0xff] }
   0x8   :  { %v619_v22 = vld [vmem:[%s863_s8 + $0x40] sm:$0xff]  ;;  %v636_v25 = vld [vmem:[%s865_s1 + $0x28] sm:$0xff]  ;;  %v633_v28 = vld [vmem:[%s865_s1 + $0x10] sm:$0xff] }
   0x9   :  { %v96_v23 = vpack.c.b16 %v94_v19, %v94_v19  ;;  %v97_v24 = vpack.c.b16 %v95_v20, %v95_v20  ;;  %v635_v26 = vld [vmem:[%s865_s1 + $0x20] sm:$0xff]  ;;  %v632_v29 = vld [vmem:[%s865_s1 + $0x8] sm:$0xff] }
   0xa   :  { %198 = vmatpush.bf16.msra.mxu0 %v616_v5  ;;  %367 = vmatpush.bf16.msrb.mxu2 %v638_v8  ;;  %v631_v30 = vld [vmem:[%s865_s1] sm:$0xff]  ;;  %v630_v41 = vld [vmem:[%s872_s12 + $0x8] sm:$0xff] }
   0xb   :  { %211 = vmatpush.bf16.msra.mxu1 %v624_v6  ;;  %v644_v31 = vld [vmem:[%s866_s9] ss:$0 sm:$0xff]  ;;  %291 = vmatpush.bf16.msra.mxu3 %v630_v41  ;;  %v640_v44 = vld [vmem:[%s873_s4 + $0x8] sm:$0xff] }
   0xc   :  { %v302_v40 = vld [vmem:[%s869_s0] sm:$0xf]  ;;  %v642_v61 = vld [vmem:[%s876_s6 + $0x8] sm:$0xff] }
   0xd   :  { %v629_v42 = vld [vmem:[%s872_s12] sm:$0xff] }
   0xe   :  { %199 = vmatpush.bf16.msra.mxu0 %v615_v9  ;;  %368 = vmatpush.bf16.msrb.mxu2 %v637_v11  ;;  %v639_v45 = vld [vmem:[%s873_s4] sm:$0xff] }
   0xf   :  { %212 = vmatpush.bf16.msra.mxu1 %v623_v10  ;;  %292 = vmatpush.bf16.msra.mxu3 %v629_v42  ;;  %v645_v46 = vld [vmem:[%s868_s11] ss:$0 sm:$0xff] }
  0x10   :  { %v301_v52 = vld [vmem:[#allocation2] sm:$0xff] }
  0x11   :  { %v646_v55 = vld [vmem:[%s870_s3] ss:$0 sm:$0xff] }
  0x12   :  { %200 = vmatpush.bf16.msra.mxu0 %v614_v12  ;;  %369 = vmatpush.bf16.msrb.mxu2 %v636_v25  ;;  %v641_v62 = vld [vmem:[%s876_s6] sm:$0xff] }
  0x13   :  { %213 = vmatpush.bf16.msra.mxu1 %v622_v13  ;;  %423 = vmatpush.bf16.msrb.mxu3 %v640_v44  ;;  %v647_v63 = vld [vmem:[%s871_s13] ss:$0 sm:$0xff] }
  0x14   :  { %v648_v5 = vld [vmem:[%s874_s5] ss:$0 sm:$0xff] }
  0x15   :  { %v649_v11 = vld [vmem:[%s875_s7] ss:$0 sm:$0xff] }
  0x16   :  { %201 = vmatpush.bf16.msra.mxu0 %v613_v14  ;;  %370 = vmatpush.bf16.msrb.mxu2 %v635_v26 }
  0x17   :  { %214 = vmatpush.bf16.msra.mxu1 %v621_v15  ;;  %424 = vmatpush.bf16.msrb.mxu3 %v639_v45 }
  0x1a   :  { %202 = vmatpush.bf16.msra.mxu0 %v612_v16  ;;  %371 = vmatpush.bf16.msrb.mxu2 %v634_v27 }
  0x1b   :  { %215 = vmatpush.bf16.msra.mxu1 %v620_v17 }
  0x1e   :  { %203 = vmatpush.bf16.msra.mxu0 %v611_v21  ;;  %372 = vmatpush.bf16.msrb.mxu2 %v633_v28 }
  0x1f   :  { %216 = vmatpush.bf16.msra.mxu1 %v619_v22 }
  0x21   :  { %204 = vmatmul.bf16.vlgmr.msra.gmra.mxu0 %v96_v23 }
  0x22   :  { %217 = vmatmul.bf16.vlgmr.msra.gmra.mxu1 %v97_v24  ;;  %373 = vmatpush.bf16.msrb.mxu2 %v632_v29 }
  0x26   :  { %374 = vmatpush.bf16.msrb.mxu2 %v631_v30 }
  0x9e   :  { %v205_v32 = vpop.f32.mrf.mxu0 }
  0x9f   :  { %v218_v33 = vpop.f32.mrf.mxu1  ;;  %v206_v34 = vadd.f32 %v644_v31, %v205_v32 }
  0xa1   :  { %v219_v35 = vadd.f32 %v218_v33, %v206_v34 }
  0xa3   :  { %v222_v36 = vmax.f32 %v219_v35, 0.0 }
  0xa5   :  { %v227_v37 = vpack.c.bf16 %v222_v36, %v222_v36 }
  0xa6   :  { %v207_v38 = vpop.f32.mrf.mxu0 }
  0xa7   :  { %v220_v39 = vpop.f32.mrf.mxu1  ;;  %551 = vmatmul.msk.bf16.vlgmr.msra.gmra.mxu2 %vm54_vm0, %v227_v37 }
  0xb7   :  { %375 = vmatmul.bf16.vlgmr.msrb.gmra.mxu2 %v302_v40 }
 0x12a   :  { %v256_v47 = vpop.f32.mrf.mxu2 }
 0x12b   :  { %v257_v48 = vadd.f32 %v645_v46, %v256_v47 }
 0x12d   :  { %v260_v49 = vmax.f32 %v257_v48, 0.0 }
 0x12f   :  { %v265_v50 = vpack.c.bf16 %v260_v49, %v260_v49 }
 0x131   :  { %560 = vmatmul.msk.bf16.vlgmr.msra.gmra.mxu3 %vm54_vm0, %v265_v50 }
 0x132   :  { %v258_v51 = vpop.f32.mrf.mxu2  ;;  %461 = vmatpush.bf16.msra.mxu3 %v642_v61 }
 0x136   :  { %462 = vmatpush.bf16.msra.mxu3 %v641_v62 }
 0x13a   :  { %v376_v53 = vpop.f32.mrf.mxu2 }
 0x13b   :  { %v380_v54 = vadd.f32 %v376_v53, %v301_v52 }
 0x13d   :  { %382 = vst.msk [vmem:[#allocation2] sm:$0xff] %vm54_vm0, %v380_v54 }
 0x142   :  { %v378_v56 = vpop.f32.mrf.mxu2 }
 0x144   :  { %v386_v57 = vld [vmem:[#allocation2] sm:$0xff] }
 0x145   :  { %v391_v58 = vadd.f32 %v646_v55, %v386_v57 }
 0x147   :  { %v392_v59 = vmax.f32 %v391_v58, 0.0 }
 0x149   :  { %v397_v60 = vpack.c.bf16 %v392_v59, %v392_v59 }
 0x14b   :  { %601 = vmatmul.msk.bf16.vlgmr.msrb.gmra.mxu3 %vm54_vm0, %v397_v60 }
 0x1b4   :  { %v294_v0 = vpop.f32.mrf.mxu3 }
 0x1b5   :  { %v295_v1 = vadd.f32 %v647_v63, %v294_v0 }
 0x1b7   :  { %v298_v2 = vmax.f32 %v295_v1, 0.0 }
 0x1b9   :  { %v299_v3 = vpack.c.bf16 %v298_v2, %v298_v2 }
 0x1bb   :  { %300 = vst [vmem:[%s877_s15] sm:$0xf] %v299_v3 }
 0x1bc   :  { %v296_v4 = vpop.f32.mrf.mxu3 }
 0x1ce   :  { %v426_v6 = vpop.f32.mrf.mxu3 }
 0x1cf   :  { %v427_v7 = vadd.f32 %v648_v5, %v426_v6 }
 0x1d1   :  { %v430_v8 = vmax.f32 %v427_v7, 0.0 }
 0x1d3   :  { %v435_v9 = vpack.c.bf16 %v430_v8, %v430_v8 }
 0x1d5   :  { %610 = vmatmul.msk.bf16.vlgmr.msra.gmra.mxu3 %vm54_vm0, %v435_v9 }
 0x1d6   :  { %v428_v10 = vpop.f32.mrf.mxu3 }
 0x258   :  { %v464_v12 = vpop.f32.mrf.mxu3 }
 0x259   :  { %v465_v13 = vadd.f32 %v649_v11, %v464_v12 }
 0x25b   :  { %v468_v14 = vmax.f32 %v465_v13, 0.0 }
 0x25d   :  { %v469_v15 = vpack.c.bf16 %v468_v14, %v468_v14 }
 0x25f   :  { %470 = vst [vmem:[%s878_s14] sm:$0xf] %v469_v15 }
 0x260   :  { %v466_v16 = vpop.f32.mrf.mxu3 }

</bundles_post_ra>
